<compile_context>
chip_gen: v6e
topology: v6e:2x2x1
jax: 0.10.0
libtpu: 0.0.40
codegen_flags: <defaults>
</compile_context>

<pallas_src>
import functools

import jax
import jax.numpy as jnp
from jax import lax
from jax.experimental import pallas as pl
from jax.experimental.pallas import tpu as pltpu


def _weighted_mse_kernel(w_ref, o_ref, t_ref, out_ref, *,
                         tile_rows, total_rows, tiles_per_part, need_mask):
    """Accumulates sum(w * (o - t)^2) over row tiles of a (R, 128) view.

    w_ref   : (1, 128) VMEM  -- repeating [0.5,0.2,0.2,0.1]/N weight pattern
    o_ref   : (tile_rows, 128) VMEM tile of outputs (original dtype)
    t_ref   : (tile_rows, 128) VMEM tile of targets (original dtype)
    out_ref : (1, 8, 128) VMEM partial-sum accumulator for this partition
              (all 8 sublanes carry identical values; wrapper reads sublane 0)
    """
    p = pl.program_id(0)   # parallel partition (independent row ranges)
    i = pl.program_id(1)   # reduction step within the partition

    @pl.when(i == 0)
    def _():
        out_ref[...] = jnp.zeros_like(out_ref)

    # Cast on load; all math in f32 (v5e has no bf16 VPU path).
    o = o_ref[...].astype(jnp.float32)
    t = t_ref[...].astype(jnp.float32)
    d = o - t
    wsq = d * d * w_ref[...]                      # (tile_rows, 128)

    if need_mask:
        # Last tile may extend past R (Pallas pads OOB block rows with garbage,
        # and o/t garbage differ) -> zero out rows >= total_rows.
        row0 = (p * tiles_per_part + i) * tile_rows
        rows = lax.broadcasted_iota(jnp.int32, (tile_rows, 1), 0) + row0
        wsq = jnp.where(rows < total_rows, wsq, 0.0)

    # Single sublane reduce per tile; keep per-lane partials, finish off-kernel.
    psum = jnp.sum(wsq, axis=0, keepdims=True)    # (1, 128)
    out_ref[...] += psum[None, :, :]              # broadcast to all 8 sublanes


def custom_loss(outputs, targets, *, tile_rows=1024):
    """Pallas implementation of CustomLoss.forward.

    loss = sum_j w_j * mean_n (outputs[n, j] - targets[n, j])^2,
    w = [0.5, 0.2, 0.2, 0.1], using only the first 4 columns.
    """
    # The module only reads columns 0..3.  When C == 4 this branch is skipped,
    # so no slice copy is materialized for the common case.
    if outputs.shape[1] != 4:
        outputs = outputs[:, :4]
        targets = targets[:, :4]

    n = outputs.shape[0]
    n_elems = n * 4

    # Lane-dense view: flatten (N, 4) -> (R, 128), R a multiple of 8.
    # Zero-padding both operands contributes 0 to the weighted SSE.
    r = pl.cdiv(n_elems, 128)
    r = ((r + 7) // 8) * 8
    padded = r * 128
    o_flat = outputs.reshape(-1)
    t_flat = targets.reshape(-1)
    if padded != n_elems:
        o_flat = jnp.pad(o_flat, (0, padded - n_elems))
        t_flat = jnp.pad(t_flat, (0, padded - n_elems))
    o2 = o_flat.reshape(r, 128)          # original dtype; cast happens in-kernel
    t2 = t_flat.reshape(r, 128)

    # Tile choice: multiple of 8 sublanes, capped at R.
    tr = min(int(tile_rows), r)
    tr = max(8, (tr // 8) * 8)
    num_tiles = pl.cdiv(r, tr)
    # 2-way split of the row range so v7x's two TensorCores each stream half
    # (only when the tile count divides evenly; harmless no-op on 1-TC chips).
    p_parts = 2 if (num_tiles >= 2 and num_tiles % 2 == 0) else 1
    t_per = num_tiles // p_parts
    need_mask = (r % tr) != 0

    # 128-wide repeating weight pattern with the 1/N of the mean folded in
    # (also keeps the f32 running sum well-scaled for large N).
    w = (jnp.tile(jnp.asarray([0.5, 0.2, 0.2, 0.1], jnp.float32), 128 // 4)
         / jnp.float32(n)).reshape(1, 128)

    kernel = functools.partial(
        _weighted_mse_kernel,
        tile_rows=tr, total_rows=r, tiles_per_part=t_per, need_mask=need_mask)

    partials = pl.pallas_call(
        kernel,
        out_shape=jax.ShapeDtypeStruct((p_parts, 8, 128), jnp.float32),
        grid=(p_parts, t_per),
        in_specs=[
            pl.BlockSpec((1, 128), lambda p, i: (0, 0)),                  # weights (resident)
            pl.BlockSpec((tr, 128), lambda p, i: (p * t_per + i, 0)),     # outputs tile
            pl.BlockSpec((tr, 128), lambda p, i: (p * t_per + i, 0)),     # targets tile
        ],
        out_specs=pl.BlockSpec((1, 8, 128), lambda p, i: (p, 0, 0)),      # per-partition acc
        compiler_params=pltpu.CompilerParams(
            dimension_semantics=("parallel", "arbitrary"),
            vmem_limit_bytes=32 * 1024 * 1024,   # tiles budgeted well under v7x's 64 MiB
        ),
    )(w, o2, t2)

    # Tiny final reduction (<= 256 values): sublane 0 of each partition.
    return jnp.sum(partials[:, 0, :])


def _reference_loss(outputs, targets):
    w = jnp.asarray([0.5, 0.2, 0.2, 0.1], dtype=jnp.float32)
    diff = outputs[:, :4].astype(jnp.float32) - targets[:, :4].astype(jnp.float32)
    return jnp.sum(jnp.mean(diff * diff, axis=0) * w)


if __name__ == "__main__":
    key = jax.random.PRNGKey(0)
    k1, k2, k3, k4 = jax.random.split(key, 4)

    # Primary small case matching the module: batch=8, 4 prediction columns.
    o1 = jax.random.normal(k1, (8, 4), dtype=jnp.float32)
    t1 = jax.random.normal(k2, (8, 4), dtype=jnp.float32)
    l1 = jax.block_until_ready(custom_loss(o1, t1))
    r1 = jax.block_until_ready(_reference_loss(o1, t1))
    assert jnp.allclose(l1, r1, rtol=1e-5, atol=1e-6), (l1, r1)

    # Exercises padding, multi-tile grid, 2-way parallel split, partial-tile mask.
    o2 = jax.random.normal(k3, (700, 4), dtype=jnp.float32)
    t2 = jax.random.normal(k4, (700, 4), dtype=jnp.float32)
    l2 = jax.block_until_ready(custom_loss(o2, t2, tile_rows=16))
    r2 = jax.block_until_ready(_reference_loss(o2, t2))
    assert jnp.allclose(l2, r2, rtol=1e-4, atol=1e-6), (l2, r2)

    print("KERNEL_OK")
</pallas_src>

<mosaic_0001>
module attributes {stable_mosaic.version = 11 : i64} {
  func.func @_weighted_mse_kernel(%arg0: i32, %arg1: i32, %arg2: memref<1x128xf32, #tpu.memory_space<vmem>>, %arg3: memref<8x128xf32, #tpu.memory_space<vmem>>, %arg4: memref<8x128xf32, #tpu.memory_space<vmem>>, %arg5: memref<1x8x128xf32, #tpu.memory_space<vmem>>) attributes {dimension_semantics = [#tpu.dimension_semantics<parallel>, #tpu.dimension_semantics<arbitrary>], iteration_bounds = array<i64: 1, 1>, scalar_prefetch = 0 : i64, scratch_operands = 0 : i64, tpu.core_type = #tpu.core_type<tc>, window_params = [{pipeline_mode = #tpu.pipeline_mode<synchronous>, transform_indices = @transform_0, window_bounds = array<i64: 1, 128>}, {transform_indices = @transform_1, window_bounds = array<i64: 8, 128>}, {transform_indices = @transform_2, window_bounds = array<i64: 8, 128>}, {transform_indices = @transform_3, window_bounds = array<i64: 1, 8, 128>}]} {
    %c0_i32 = arith.constant 0 : i32
    %0 = arith.cmpi eq, %arg1, %c0_i32 : i32
    %1 = arith.extui %0 : i1 to i32
    %c0_i32_0 = arith.constant 0 : i32
    %2 = arith.cmpi ne, %1, %c0_i32_0 : i32
    scf.if %2 {
      %cst_12 = arith.constant 0.000000e+00 : f32
      %17 = vector.broadcast %cst_12 : f32 to vector<1x8x128xf32>
      %c0_13 = arith.constant 0 : index
      %c0_14 = arith.constant 0 : index
      %c0_15 = arith.constant 0 : index
      %18 = vector.load %arg5[%c0_13, %c0_14, %c0_15] : memref<1x8x128xf32, #tpu.memory_space<vmem>>, vector<1x8x128xf32>
      tpu.vector_store %arg5[%c0_13, %c0_14, %c0_15], %17 {strides = array<i32>} : memref<1x8x128xf32, #tpu.memory_space<vmem>>, vector<1x8x128xf32>,
    } else {
    }
    %c0 = arith.constant 0 : index
    %c0_1 = arith.constant 0 : index
    %3 = vector.load %arg3[%c0, %c0_1] : memref<8x128xf32, #tpu.memory_space<vmem>>, vector<8x128xf32>
    %c0_2 = arith.constant 0 : index
    %c0_3 = arith.constant 0 : index
    %4 = vector.load %arg4[%c0_2, %c0_3] : memref<8x128xf32, #tpu.memory_space<vmem>>, vector<8x128xf32>
    %5 = arith.subf %3, %4 : vector<8x128xf32>
    %6 = arith.mulf %5, %5 : vector<8x128xf32>
    %c0_4 = arith.constant 0 : index
    %c0_5 = arith.constant 0 : index
    %7 = vector.load %arg2[%c0_4, %c0_5] : memref<1x128xf32, #tpu.memory_space<vmem>>, vector<1x128xf32>
    %8 = vector.broadcast %7 : vector<1x128xf32> to vector<8x128xf32>
    %9 = arith.mulf %6, %8 : vector<8x128xf32>
    %cst = arith.constant dense<0.000000e+00> : vector<128xf32>
    %10 = vector.multi_reduction <add>, %9, %cst [0] : vector<8x128xf32> to vector<128xf32>
    %11 = vector.shape_cast %10 : vector<128xf32> to vector<1x128xf32>
    %c0_6 = arith.constant 0 : index
    %c0_7 = arith.constant 0 : index
    %c0_8 = arith.constant 0 : index
    %12 = vector.load %arg5[%c0_6, %c0_7, %c0_8] : memref<1x8x128xf32, #tpu.memory_space<vmem>>, vector<1x8x128xf32>
    %13 = vector.shape_cast %11 : vector<1x128xf32> to vector<1x1x128xf32>
    %14 = vector.broadcast %13 : vector<1x1x128xf32> to vector<1x8x128xf32>
    %15 = arith.addf %12, %14 : vector<1x8x128xf32>
    %c0_9 = arith.constant 0 : index
    %c0_10 = arith.constant 0 : index
    %c0_11 = arith.constant 0 : index
    %16 = vector.load %arg5[%c0_9, %c0_10, %c0_11] : memref<1x8x128xf32, #tpu.memory_space<vmem>>, vector<1x8x128xf32>
    tpu.vector_store %arg5[%c0_9, %c0_10, %c0_11], %15 {strides = array<i32>} : memref<1x8x128xf32, #tpu.memory_space<vmem>>, vector<1x8x128xf32>,
    return
  }
  func.func @transform_0(%arg0: i32, %arg1: i32) -> (i32, i32) {
    %c0_i32 = arith.constant 0 : i32
    %c0_i32_0 = arith.constant 0 : i32
    %c0_i32_1 = arith.constant 0 : i32
    return %c0_i32, %c0_i32_0 : i32, i32
  }
  func.func @transform_1(%arg0: i32, %arg1: i32) -> (i32, i32) {
    %c1_i32 = arith.constant 1 : i32
    %0 = arith.muli %arg0, %c1_i32 : i32
    %1 = arith.addi %0, %arg1 : i32
    %c0_i32 = arith.constant 0 : i32
    %c0_i32_0 = arith.constant 0 : i32
    return %1, %c0_i32 : i32, i32
  }
  func.func @transform_2(%arg0: i32, %arg1: i32) -> (i32, i32) {
    %c1_i32 = arith.constant 1 : i32
    %0 = arith.muli %arg0, %c1_i32 : i32
    %1 = arith.addi %0, %arg1 : i32
    %c0_i32 = arith.constant 0 : i32
    %c0_i32_0 = arith.constant 0 : i32
    return %1, %c0_i32 : i32, i32
  }
  func.func @transform_3(%arg0: i32, %arg1: i32) -> (i32, i32, i32) {
    %c0_i32 = arith.constant 0 : i32
    %c0_i32_0 = arith.constant 0 : i32
    %c0_i32_1 = arith.constant 0 : i32
    return %arg0, %c0_i32, %c0_i32_0 : i32, i32, i32
  }
}

</mosaic_0001>

<bundles_post_ra>
// kernel: tpu_custom_call.1
= control target key start
LH: loop header
LB: loop body
LE: loop exit
PB: predicated region body
PF: predicated region fallthrough
CT: control target
= control target key end

     0   :  { %8 = vsyncpa [#allocation3], 0  ;;  %s228_s0 = inlined_call_operand.hbm [shape: f32[1,128], index: 0, kind: input, shape index: {}]   ;;  %s229_s1 = inlined_call_operand.hbm [shape: f32[8,128], index: 1, kind: input, shape index: {}]   ;;  %s230_s2 = inlined_call_operand.hbm [shape: f32[8,128], index: 2, kind: input, shape index: {}]   ;;  %s231_s3 = inlined_call_operand.hbm [shape: f32[1,8,128], index: 3, kind: output, shape index: {}]  }
   0x1   :  { %9 = vsyncpa [#allocation6], 0 }
   0x2   :  { %10 = vsyncpa [#allocation4], 0  ;;  %s192_s12 = smov [#allocation5]   ;;  %s193_s14 = smov [#allocation2]  }
   0x3   :  { %s30_s13 = sshll.u32 %s192_s12, 4  ;;  %s17_s15 = sshll.u32 %s193_s14, 4  ;;  %s31_s13 = int_to_ptr.vmem [resolvable:$true] %s30_s13  ;;  %s18_s15 = int_to_ptr.vmem [resolvable:$true] %s17_s15 }
   0x4   :  { %s114_s16 = scalar_lea.vmem %s31_s13, 128  ;;  %p119_p1 = scmp.lt.s32.totalorder %s31_s13, %s31_s13 }
   0x5   :  { %p115_p0 = scmp.ne.s32.totalorder %s31_s13, %s114_s16  ;;  %p120_p2 = scmp.lt.s32.totalorder %s114_s16, %s114_s16 }
   0x7   :  { %p121_p3 = por %p120_p2, %p119_p1 }
   0x9   :  { %p122_p4 = pnand %p121_p3, %p115_p0 }
   0xb   :  { %125 = shalt.err (!%p122_p4)
}
   0xc   :  { %33 = dma.hbm_to_vmem [thread:$0]  %s229_s1, 128, %s31_s13, [#allocation6]  }
   0xd   :  { %s134_s19 = scalar_lea.vmem %s18_s15, 16  ;;  %s138_s20 = scalar_lea.vmem %s18_s15, 32 }
   0xe   :  { %p135_p5 = scmp.ne.s32.totalorder %s18_s15, %s134_s19  ;;  %p139_p6 = scmp.lt.s32.totalorder %s18_s15, %s18_s15 }
   0xf   :  { %p140_p7 = scmp.lt.s32.totalorder %s138_s20, %s134_s19 }
  0x11   :  { %p141_p8 = por %p140_p7, %p139_p6 }
  0x13   :  { %p142_p9 = pnand %p141_p8, %p135_p5 }
  0x15   :  { %145 = shalt.err (!%p142_p9)
}
  0x16   :  { %20 = dma.hbm_to_vmem [thread:$0]  %s228_s0, 16, %s18_s15, [#allocation3]  }
  0x17   :  { %s194_s23 = smov [#allocation7]  }
  0x18   :  { %s43_s24 = sshll.u32 %s194_s23, 4  ;;  %s44_s24 = int_to_ptr.vmem [resolvable:$true] %s43_s24 }
  0x19   :  { %s154_s25 = scalar_lea.vmem %s44_s24, 128  ;;  %p159_p11 = scmp.lt.s32.totalorder %s44_s24, %s44_s24 }
  0x1a   :  { %p155_p10 = scmp.ne.s32.totalorder %s44_s24, %s154_s25  ;;  %p160_p12 = scmp.lt.s32.totalorder %s154_s25, %s154_s25 }
  0x1c   :  { %p161_p13 = por %p160_p12, %p159_p11 }
  0x1e   :  { %p162_p0 = pnand %p161_p13, %p155_p10 }
  0x20   :  { %165 = shalt.err (!%p162_p0)
}
  0x21   :  { %46 = dma.hbm_to_vmem [thread:$0]  %s230_s2, 128, %s44_s24, [#allocation6]  }
  0x22   :  { %186 = dma.done.wait [#allocation3], 16  }
  0x23   :  { %187 = vsyncadd [#allocation3], 4294967280 }
  0x24   :  { %188 = dma.done.wait [#allocation6], 256  }
  0x25   :  { %189 = vsyncadd [#allocation6], 4294967040  ;;  %v63_v0 = vld [vmem:[#allocation5] sm:$0xff]  ;;  %v64_v1 = vld [vmem:[#allocation7] sm:$0xff]  ;;  %s195_s0 = smov [#allocation8]  }
  0x26   :  { %v65_v2 = vsub.f32 %v63_v0, %v64_v1  ;;  %v100_v3 = vld [vmem:[#allocation2] ss:$0 sm:$0xff]  ;;  %s90_s27 = sshll.u32 %s195_s0, 4  ;;  %s91_s27 = int_to_ptr.vmem [resolvable:$true] %s90_s27 }
  0x27   :  { %s166_s2 = scalar_lea.vmem %s91_s27, 128  ;;  %p171_p2 = scmp.lt.s32.totalorder %s91_s27, %s91_s27 }
  0x28   :  { %v66_v4 = vmul.f32 %v65_v2, %v65_v2  ;;  %p167_p1 = scmp.ne.s32.totalorder %s91_s27, %s166_s2  ;;  %p172_p3 = scmp.lt.s32.totalorder %s166_s2, %s166_s2 }
  0x2a   :  { %v74_v5 = vmul.f32 %v100_v3, %v66_v4  ;;  %p173_p4 = por %p172_p3, %p171_p2 }
  0x2c   :  { %v75_v6 = vrot.slane %v74_v5, 4  ;;  %p174_p5 = pnand %p173_p4, %p167_p1 }
  0x2e   :  { %v76_v7 = vadd.f32 %v75_v6, %v74_v5 }
  0x30   :  { %v77_v8 = vrot.slane %v76_v7, 2 }
  0x32   :  { %v78_v9 = vadd.f32 %v77_v8, %v76_v7 }
  0x34   :  { %v79_v10 = vrot.slane %v78_v9, 1 }
  0x36   :  { %v80_v11 = vadd.f32 %v79_v10, %v78_v9 }
  0x38   :  { %83 = vst [vmem:[#allocation8] sm:$0xff] %v80_v11 }
  0x39   :  { %177 = shalt.err (!%p174_p5)
}
  0x3a   :  { %93 = dma.vmem_to_hbm [thread:$0]  %s91_s27, 128, %s231_s3, [#allocation4]  }
  0x3b   :  { %190 = dma.done.wait [#allocation4], 128  }
  0x3c   :  { %191 = vsyncadd [#allocation4], 4294967168 }
  0x3d   :  { %97 = vsyncpa [#allocation3], 1 }
  0x3e   :  { %98 = vsyncpa [#allocation6], 1 }
  0x3f   :  { %99 = vsyncpa [#allocation4], 1 }

</bundles_post_ra>
